<compile_context>
chip_gen: v5e
topology: v5e:2x2
jax: 0.10.0
libtpu: 0.0.40
codegen_flags: <defaults>
</compile_context>

<pallas_src>
import math

import jax
import jax.numpy as jnp
from jax.experimental import pallas as pl
from jax.experimental.pallas import tpu as pltpu

# ---- config (small, consistent with the GPTConfig fields used by the module) ----
B = 2          # batch
T = 8          # seq_len
D = 32         # d_model
N_HEADS = 4    # n_heads
MLP_RATIO = 4  # mlp_ratio
HEAD_DIM = D // N_HEADS
LN_EPS = 1e-5
BT = B * T                 # flattened rows
HB = N_HEADS * B           # head-major (h, b) attention batch


def _layernorm(v, w, b):
    mu = jnp.mean(v, axis=-1, keepdims=True)
    var = jnp.mean((v - mu) ** 2, axis=-1, keepdims=True)
    return (v - mu) * jax.lax.rsqrt(var + LN_EPS) * w + b


def _new_gelu(x):
    return 0.5 * x * (1.0 + jnp.tanh(math.sqrt(2.0 / math.pi) * (x + 0.044715 * x ** 3)))


def gpt_block_kernel(x_ref, bias_ref,
                     ln1w_ref, ln1b_ref,
                     wqkv_ref, bqkv_ref, wo_ref, bo_ref,
                     ln2w_ref, ln2b_ref,
                     wfc_ref, bfc_ref, wpr_ref, bpr_ref,
                     o_ref):
    # Whole (B*T, D) activation slab, single invocation.
    x = x_ref[...].astype(jnp.float32)                                  # (BT, D)

    # ---- ln_1 + fused QKV projection over all B*T rows (one MXU matmul) ----
    h = _layernorm(x, ln1w_ref[0], ln1b_ref[0])                         # (BT, D)
    qkv = jnp.dot(h, wqkv_ref[...],
                  preferred_element_type=jnp.float32) + bqkv_ref[0]     # (BT, 3D)

    # Build head-major (h, b)-batched q/k/v: static lane slices + leading-dim stack.
    # (Layout plumbing only; avoids in-kernel 4-D transposes.)
    def to_heads(col_off):
        pieces = [qkv[:, col_off + hh * HEAD_DIM: col_off + (hh + 1) * HEAD_DIM]
                  for hh in range(N_HEADS)]                             # each (BT, hd)
        return jnp.stack(pieces, axis=0).reshape(HB, T, HEAD_DIM)       # (H*B, T, hd)

    q = to_heads(0 * D)    # batch index = h*B + b
    k = to_heads(1 * D)
    v = to_heads(2 * D)

    # ---- attention: ONE batched contraction for QK^T and ONE for att@V ----
    scale = 1.0 / math.sqrt(HEAD_DIM)
    att = jnp.einsum('bqd,bkd->bqk', q, k,
                     preferred_element_type=jnp.float32) * scale        # (HB, T, T)
    att = att + bias_ref[...]                 # bias pre-arranged as (HB, T, T) in wrapper
    att = att - jnp.max(att, axis=-1, keepdims=True)
    p = jnp.exp(att)
    att = p * pl.reciprocal(jnp.sum(p, axis=-1, keepdims=True), approx=True)

    y = jnp.einsum('bqk,bkd->bqd', att, v,
                   preferred_element_type=jnp.float32)                  # (HB, T, hd)

    # Output projection with NO cross-lane concat:
    #   concat_h(y_h) @ Wo == sum_h y_h @ Wo[h*hd:(h+1)*hd, :]
    attn_out = jnp.zeros((BT, D), jnp.float32)
    for hh in range(N_HEADS):
        y_h = y[hh * B:(hh + 1) * B].reshape(BT, HEAD_DIM)              # (BT, hd)
        attn_out = attn_out + jnp.dot(
            y_h, wo_ref[hh * HEAD_DIM:(hh + 1) * HEAD_DIM, :],
            preferred_element_type=jnp.float32)
    x = x + attn_out + bo_ref[0]                                        # residual 1

    # ---- ln_2 + MLP over all B*T rows ----
    h2 = _layernorm(x, ln2w_ref[0], ln2b_ref[0])
    fc = jnp.dot(h2, wfc_ref[...], preferred_element_type=jnp.float32) + bfc_ref[0]
    g = _new_gelu(fc)
    mlp = jnp.dot(g, wpr_ref[...], preferred_element_type=jnp.float32) + bpr_ref[0]

    o_ref[...] = (x + mlp).astype(o_ref.dtype)                          # residual 2


def gpt_block(x, attention_bias, params):
    """x: (B, T, D) float32. attention_bias: broadcastable to (B, n_heads, T, T)."""
    (ln1w, ln1b, wqkv, bqkv, wo, bo, ln2w, ln2b, wfc, bfc, wpr, bpr) = params

    # Wrapper-side layout plumbing (free): lane-dense (B*T, D) activation slab and a
    # head-major (H*B, T, T) attention bias matching the kernel's attention batch.
    x2d = x.reshape(BT, D)
    bias_full = jnp.broadcast_to(attention_bias, (B, N_HEADS, T, T))
    bias_hb = jnp.transpose(bias_full, (1, 0, 2, 3)).reshape(HB, T, T)

    inputs = (x2d, bias_hb, ln1w, ln1b, wqkv, bqkv, wo, bo,
              ln2w, ln2b, wfc, bfc, wpr, bpr)

    # Whole arrays resident in VMEM, single invocation (no grid, no pipelining).
    in_specs = [pl.BlockSpec(memory_space=pltpu.MemorySpace.VMEM) for _ in inputs]
    out_specs = pl.BlockSpec(memory_space=pltpu.MemorySpace.VMEM)

    flops = (2 * BT * D * (3 * D)                     # qkv projection
             + 2 * HB * T * T * HEAD_DIM * 2          # QK^T and att@V
             + 2 * BT * D * D                         # out projection
             + 2 * BT * D * (MLP_RATIO * D) * 2)      # fc + proj
    transcendentals = (HB * T * T                     # exp in softmax
                       + HB * T                       # approx reciprocal
                       + BT * MLP_RATIO * D           # tanh in GELU
                       + 2 * BT)                      # rsqrt in the two LayerNorms
    bytes_accessed = (sum(int(a.size) * a.dtype.itemsize for a in inputs)
                      + BT * D * x.dtype.itemsize)

    out2d = pl.pallas_call(
        gpt_block_kernel,
        out_shape=jax.ShapeDtypeStruct((BT, D), x.dtype),
        in_specs=in_specs,
        out_specs=out_specs,
        cost_estimate=pl.CostEstimate(flops=flops,
                                      transcendentals=transcendentals,
                                      bytes_accessed=bytes_accessed),
        compiler_params=pltpu.CompilerParams(vmem_limit_bytes=16 * 1024 * 1024),
    )(*inputs)

    return out2d.reshape(B, T, D)


def _ref_forward(x, bias, params):
    """Pure-JAX reference identical to the PyTorch forward (eval mode)."""
    (ln1w, ln1b, wqkv, bqkv, wo, bo, ln2w, ln2b, wfc, bfc, wpr, bpr) = params
    h = _layernorm(x, ln1w[0], ln1b[0])
    qkv = h @ wqkv + bqkv[0]
    q, k, v = jnp.split(qkv, 3, axis=-1)

    def heads(t):  # (B,T,D) -> (B,H,T,hd)
        return t.reshape(B, T, N_HEADS, HEAD_DIM).transpose(0, 2, 1, 3)

    q, k, v = heads(q), heads(k), heads(v)
    att = jnp.einsum("bhqd,bhkd->bhqk", q, k) / math.sqrt(HEAD_DIM)
    att = att + bias
    att = jax.nn.softmax(att, axis=-1)
    y = jnp.einsum("bhqk,bhkd->bhqd", att, v).transpose(0, 2, 1, 3).reshape(B, T, D)
    y = y @ wo + bo[0]
    x = x + y
    h2 = _layernorm(x, ln2w[0], ln2b[0])
    mlp = _new_gelu(h2 @ wfc + bfc[0]) @ wpr + bpr[0]
    return x + mlp


if __name__ == "__main__":
    key = jax.random.PRNGKey(0)
    ks = jax.random.split(key, 16)

    x = jax.random.normal(ks[0], (B, T, D), dtype=jnp.float32)

    # causal attention bias, broadcastable over batch: (1, n_heads, T, T)
    causal = jnp.tril(jnp.ones((T, T), dtype=jnp.float32))
    attention_bias = jnp.where(causal[None, None] > 0, 0.0, -1e9).astype(jnp.float32)
    attention_bias = jnp.broadcast_to(attention_bias, (1, N_HEADS, T, T))

    def init_linear(kw, kb, fan_in, fan_out):
        # deterministic, small-scale init; weight stored as (in, out)
        w = jax.random.normal(kw, (fan_in, fan_out), dtype=jnp.float32) * (1.0 / math.sqrt(fan_in))
        b = jax.random.normal(kb, (1, fan_out), dtype=jnp.float32) * 0.01
        return w, b

    ln1w = jnp.ones((1, D), jnp.float32) + 0.05 * jax.random.normal(ks[1], (1, D))
    ln1b = 0.05 * jax.random.normal(ks[2], (1, D))
    wqkv, bqkv = init_linear(ks[3], ks[4], D, 3 * D)
    wo, bo = init_linear(ks[5], ks[6], D, D)
    ln2w = jnp.ones((1, D), jnp.float32) + 0.05 * jax.random.normal(ks[7], (1, D))
    ln2b = 0.05 * jax.random.normal(ks[8], (1, D))
    wfc, bfc = init_linear(ks[9], ks[10], D, MLP_RATIO * D)
    wpr, bpr = init_linear(ks[11], ks[12], MLP_RATIO * D, D)

    params = (ln1w, ln1b, wqkv, bqkv, wo, bo, ln2w, ln2b, wfc, bfc, wpr, bpr)

    out = gpt_block(x, attention_bias, params)
    out = jax.block_until_ready(out)

    ref = _ref_forward(x, attention_bias, params)
    assert out.shape == (B, T, D)
    # Tolerance slightly relaxed vs. pure-f32 reference because the softmax uses the
    # EUP approximate reciprocal (pl.reciprocal(approx=True)).
    assert jnp.allclose(out, ref, atol=1e-2, rtol=1e-2), "mismatch vs pure-JAX reference"

    print("KERNEL_OK")
</pallas_src>

<mosaic_0001>
module attributes {stable_mosaic.version = 11 : i64} {
  func.func @gpt_block_kernel(%arg0: memref<16x32xf32, #tpu.memory_space<vmem>>, %arg1: memref<8x8x8xf32, #tpu.memory_space<vmem>>, %arg2: memref<1x32xf32, #tpu.memory_space<vmem>>, %arg3: memref<1x32xf32, #tpu.memory_space<vmem>>, %arg4: memref<32x96xf32, #tpu.memory_space<vmem>>, %arg5: memref<1x96xf32, #tpu.memory_space<vmem>>, %arg6: memref<32x32xf32, #tpu.memory_space<vmem>>, %arg7: memref<1x32xf32, #tpu.memory_space<vmem>>, %arg8: memref<1x32xf32, #tpu.memory_space<vmem>>, %arg9: memref<1x32xf32, #tpu.memory_space<vmem>>, %arg10: memref<32x128xf32, #tpu.memory_space<vmem>>, %arg11: memref<1x128xf32, #tpu.memory_space<vmem>>, %arg12: memref<128x32xf32, #tpu.memory_space<vmem>>, %arg13: memref<1x32xf32, #tpu.memory_space<vmem>>, %arg14: memref<16x32xf32, #tpu.memory_space<vmem>>) attributes {dimension_semantics = [], scalar_prefetch = 0 : i64, scratch_operands = 0 : i64, tpu.core_type = #tpu.core_type<tc>} {
    %c0 = arith.constant 0 : index
    %c0_0 = arith.constant 0 : index
    %0 = vector.load %arg0[%c0, %c0_0] : memref<16x32xf32, #tpu.memory_space<vmem>>, vector<16x32xf32>
    %c0_1 = arith.constant 0 : index
    %c0_2 = arith.constant 0 : index
    %1 = vector.load %arg2[%c0_1, %c0_2] : memref<1x32xf32, #tpu.memory_space<vmem>>, vector<1x32xf32>
    %2 = vector.shape_cast %1 : vector<1x32xf32> to vector<32xf32>
    %c0_3 = arith.constant 0 : index
    %c0_4 = arith.constant 0 : index
    %3 = vector.load %arg3[%c0_3, %c0_4] : memref<1x32xf32, #tpu.memory_space<vmem>>, vector<1x32xf32>
    %4 = vector.shape_cast %3 : vector<1x32xf32> to vector<32xf32>
    %cst = arith.constant dense<0.000000e+00> : vector<16xf32>
    %5 = vector.multi_reduction <add>, %0, %cst [1] : vector<16x32xf32> to vector<16xf32>
    %6 = vector.shape_cast %5 : vector<16xf32> to vector<16x1xf32>
    %cst_5 = arith.constant 3.200000e+01 : f32
    %7 = vector.broadcast %cst_5 : f32 to vector<16x1xf32>
    %8 = arith.divf %6, %7 : vector<16x1xf32>
    %9 = vector.broadcast %8 : vector<16x1xf32> to vector<16x32xf32>
    %10 = arith.subf %0, %9 : vector<16x32xf32>
    %11 = arith.mulf %10, %10 : vector<16x32xf32>
    %cst_6 = arith.constant dense<0.000000e+00> : vector<16xf32>
    %12 = vector.multi_reduction <add>, %11, %cst_6 [1] : vector<16x32xf32> to vector<16xf32>
    %13 = vector.shape_cast %12 : vector<16xf32> to vector<16x1xf32>
    %cst_7 = arith.constant 3.200000e+01 : f32
    %14 = vector.broadcast %cst_7 : f32 to vector<16x1xf32>
    %15 = arith.divf %13, %14 : vector<16x1xf32>
    %16 = vector.broadcast %8 : vector<16x1xf32> to vector<16x32xf32>
    %17 = arith.subf %0, %16 : vector<16x32xf32>
    %cst_8 = arith.constant 9.99999974E-6 : f32
    %18 = vector.broadcast %cst_8 : f32 to vector<16x1xf32>
    %19 = arith.addf %15, %18 : vector<16x1xf32>
    %20 = math.rsqrt %19 : vector<16x1xf32>
    %21 = vector.broadcast %20 : vector<16x1xf32> to vector<16x32xf32>
    %22 = arith.mulf %17, %21 : vector<16x32xf32>
    %23 = vector.shape_cast %2 : vector<32xf32> to vector<1x32xf32>
    %24 = vector.broadcast %23 : vector<1x32xf32> to vector<16x32xf32>
    %25 = arith.mulf %22, %24 : vector<16x32xf32>
    %26 = vector.shape_cast %4 : vector<32xf32> to vector<1x32xf32>
    %27 = vector.broadcast %26 : vector<1x32xf32> to vector<16x32xf32>
    %28 = arith.addf %25, %27 : vector<16x32xf32>
    %c0_9 = arith.constant 0 : index
    %c0_10 = arith.constant 0 : index
    %29 = vector.load %arg4[%c0_9, %c0_10] : memref<32x96xf32, #tpu.memory_space<vmem>>, vector<32x96xf32>
    %cst_11 = arith.constant dense<0.000000e+00> : vector<16x96xf32>
    %30 = tpu.matmul %28, %29, %cst_11 {dimension_numbers = #tpu.dot_dimension_numbers<[1], [0], [0], [1], [0, 0, 1, 1], [], []>} : vector<16x32xf32>, vector<32x96xf32>, vector<16x96xf32> -> vector<16x96xf32>
    %c0_12 = arith.constant 0 : index
    %c0_13 = arith.constant 0 : index
    %31 = vector.load %arg5[%c0_12, %c0_13] : memref<1x96xf32, #tpu.memory_space<vmem>>, vector<1x96xf32>
    %32 = vector.shape_cast %31 : vector<1x96xf32> to vector<96xf32>
    %33 = vector.shape_cast %32 : vector<96xf32> to vector<1x96xf32>
    %34 = vector.broadcast %33 : vector<1x96xf32> to vector<16x96xf32>
    %35 = arith.addf %30, %34 : vector<16x96xf32>
    %36 = vector.extract_strided_slice %35 {offsets = [0, 0], sizes = [16, 8], strides = [1, 1]} : vector<16x96xf32> to vector<16x8xf32>
    %37 = vector.extract_strided_slice %35 {offsets = [0, 8], sizes = [16, 8], strides = [1, 1]} : vector<16x96xf32> to vector<16x8xf32>
    %38 = vector.extract_strided_slice %35 {offsets = [0, 16], sizes = [16, 8], strides = [1, 1]} : vector<16x96xf32> to vector<16x8xf32>
    %39 = vector.extract_strided_slice %35 {offsets = [0, 24], sizes = [16, 8], strides = [1, 1]} : vector<16x96xf32> to vector<16x8xf32>
    %40 = vector.shape_cast %36 : vector<16x8xf32> to vector<1x16x8xf32>
    %41 = vector.shape_cast %37 : vector<16x8xf32> to vector<1x16x8xf32>
    %42 = vector.shape_cast %38 : vector<16x8xf32> to vector<1x16x8xf32>
    %43 = vector.shape_cast %39 : vector<16x8xf32> to vector<1x16x8xf32>
    %44 = tpu.concatenate %40, %41, %42, %43 in 0 : vector<1x16x8xf32>, vector<1x16x8xf32>, vector<1x16x8xf32>, vector<1x16x8xf32> -> vector<4x16x8xf32>
    %45 = vector.shape_cast %44 : vector<4x16x8xf32> to vector<8x8x8xf32>
    %46 = vector.extract_strided_slice %35 {offsets = [0, 32], sizes = [16, 8], strides = [1, 1]} : vector<16x96xf32> to vector<16x8xf32>
    %47 = vector.extract_strided_slice %35 {offsets = [0, 40], sizes = [16, 8], strides = [1, 1]} : vector<16x96xf32> to vector<16x8xf32>
    %48 = vector.extract_strided_slice %35 {offsets = [0, 48], sizes = [16, 8], strides = [1, 1]} : vector<16x96xf32> to vector<16x8xf32>
    %49 = vector.extract_strided_slice %35 {offsets = [0, 56], sizes = [16, 8], strides = [1, 1]} : vector<16x96xf32> to vector<16x8xf32>
    %50 = vector.shape_cast %46 : vector<16x8xf32> to vector<1x16x8xf32>
    %51 = vector.shape_cast %47 : vector<16x8xf32> to vector<1x16x8xf32>
    %52 = vector.shape_cast %48 : vector<16x8xf32> to vector<1x16x8xf32>
    %53 = vector.shape_cast %49 : vector<16x8xf32> to vector<1x16x8xf32>
    %54 = tpu.concatenate %50, %51, %52, %53 in 0 : vector<1x16x8xf32>, vector<1x16x8xf32>, vector<1x16x8xf32>, vector<1x16x8xf32> -> vector<4x16x8xf32>
    %55 = vector.shape_cast %54 : vector<4x16x8xf32> to vector<8x8x8xf32>
    %56 = vector.extract_strided_slice %35 {offsets = [0, 64], sizes = [16, 8], strides = [1, 1]} : vector<16x96xf32> to vector<16x8xf32>
    %57 = vector.extract_strided_slice %35 {offsets = [0, 72], sizes = [16, 8], strides = [1, 1]} : vector<16x96xf32> to vector<16x8xf32>
    %58 = vector.extract_strided_slice %35 {offsets = [0, 80], sizes = [16, 8], strides = [1, 1]} : vector<16x96xf32> to vector<16x8xf32>
    %59 = vector.extract_strided_slice %35 {offsets = [0, 88], sizes = [16, 8], strides = [1, 1]} : vector<16x96xf32> to vector<16x8xf32>
    %60 = vector.shape_cast %56 : vector<16x8xf32> to vector<1x16x8xf32>
    %61 = vector.shape_cast %57 : vector<16x8xf32> to vector<1x16x8xf32>
    %62 = vector.shape_cast %58 : vector<16x8xf32> to vector<1x16x8xf32>
    %63 = vector.shape_cast %59 : vector<16x8xf32> to vector<1x16x8xf32>
    %64 = tpu.concatenate %60, %61, %62, %63 in 0 : vector<1x16x8xf32>, vector<1x16x8xf32>, vector<1x16x8xf32>, vector<1x16x8xf32> -> vector<4x16x8xf32>
    %65 = vector.shape_cast %64 : vector<4x16x8xf32> to vector<8x8x8xf32>
    "tpu.trace_start"() <{level = 10 : i32, message = "bqd,bkd->bqk"}> : () -> ()
    %cst_14 = arith.constant dense<0.000000e+00> : vector<8x8x8xf32>
    %66 = tpu.matmul %45, %55, %cst_14 {dimension_numbers = #tpu.dot_dimension_numbers<[2], [2], [1], [1], [0, 0, 0, 1, 1, 1], [0], [0]>} : vector<8x8x8xf32>, vector<8x8x8xf32>, vector<8x8x8xf32> -> vector<8x8x8xf32>
    "tpu.trace_stop"() : () -> ()
    %cst_15 = arith.constant 0.353553385 : f32
    %67 = vector.broadcast %cst_15 : f32 to vector<8x8x8xf32>
    %68 = arith.mulf %66, %67 : vector<8x8x8xf32>
    %c0_16 = arith.constant 0 : index
    %c0_17 = arith.constant 0 : index
    %c0_18 = arith.constant 0 : index
    %69 = vector.load %arg1[%c0_16, %c0_17, %c0_18] : memref<8x8x8xf32, #tpu.memory_space<vmem>>, vector<8x8x8xf32>
    %70 = arith.addf %68, %69 : vector<8x8x8xf32>
    %cst_19 = arith.constant dense<0xFF800000> : vector<8x8xf32>
    %71 = vector.multi_reduction <maximumf>, %70, %cst_19 [2] : vector<8x8x8xf32> to vector<8x8xf32>
    %72 = vector.shape_cast %71 : vector<8x8xf32> to vector<8x8x1xf32>
    %73 = vector.broadcast %72 : vector<8x8x1xf32> to vector<8x8x8xf32>
    %74 = arith.subf %70, %73 : vector<8x8x8xf32>
    %75 = math.exp %74 : vector<8x8x8xf32>
    %cst_20 = arith.constant dense<0.000000e+00> : vector<8x8xf32>
    %76 = vector.multi_reduction <add>, %75, %cst_20 [2] : vector<8x8x8xf32> to vector<8x8xf32>
    %77 = vector.shape_cast %76 : vector<8x8xf32> to vector<8x8x1xf32>
    %78 = tpu.reciprocal %77 {approx = true} : vector<8x8x1xf32> -> vector<8x8x1xf32>
    %79 = vector.broadcast %78 : vector<8x8x1xf32> to vector<8x8x8xf32>
    %80 = arith.mulf %75, %79 : vector<8x8x8xf32>
    "tpu.trace_start"() <{level = 10 : i32, message = "bqk,bkd->bqd"}> : () -> ()
    %cst_21 = arith.constant dense<0.000000e+00> : vector<8x8x8xf32>
    %81 = tpu.matmul %80, %65, %cst_21 {dimension_numbers = #tpu.dot_dimension_numbers<[2], [1], [1], [2], [0, 0, 0, 1, 1, 2], [0], [0]>} : vector<8x8x8xf32>, vector<8x8x8xf32>, vector<8x8x8xf32> -> vector<8x8x8xf32>
    %cst_22 = arith.constant 0.000000e+00 : f32
    "tpu.trace_stop"() : () -> ()
    %82 = vector.broadcast %cst_22 : f32 to vector<16x32xf32>
    %83 = vector.extract_strided_slice %81 {offsets = [0, 0, 0], sizes = [2, 8, 8], strides = [1, 1, 1]} : vector<8x8x8xf32> to vector<2x8x8xf32>
    %84 = vector.shape_cast %83 : vector<2x8x8xf32> to vector<16x8xf32>
    %c0_23 = arith.constant 0 : index
    %c0_24 = arith.constant 0 : index
    %85 = vector.load %arg6[%c0_23, %c0_24] : memref<32x32xf32, #tpu.memory_space<vmem>>, vector<8x32xf32>
    %cst_25 = arith.constant dense<0.000000e+00> : vector<16x32xf32>
    %86 = tpu.matmul %84, %85, %cst_25 {dimension_numbers = #tpu.dot_dimension_numbers<[1], [0], [0], [1], [0, 0, 1, 1], [], []>} : vector<16x8xf32>, vector<8x32xf32>, vector<16x32xf32> -> vector<16x32xf32>
    %87 = arith.addf %82, %86 : vector<16x32xf32>
    %88 = vector.extract_strided_slice %81 {offsets = [2, 0, 0], sizes = [2, 8, 8], strides = [1, 1, 1]} : vector<8x8x8xf32> to vector<2x8x8xf32>
    %89 = vector.shape_cast %88 : vector<2x8x8xf32> to vector<16x8xf32>
    %c8 = arith.constant 8 : index
    %c0_26 = arith.constant 0 : index
    %90 = vector.load %arg6[%c8, %c0_26] : memref<32x32xf32, #tpu.memory_space<vmem>>, vector<8x32xf32>
    %cst_27 = arith.constant dense<0.000000e+00> : vector<16x32xf32>
    %91 = tpu.matmul %89, %90, %cst_27 {dimension_numbers = #tpu.dot_dimension_numbers<[1], [0], [0], [1], [0, 0, 1, 1], [], []>} : vector<16x8xf32>, vector<8x32xf32>, vector<16x32xf32> -> vector<16x32xf32>
    %92 = arith.addf %87, %91 : vector<16x32xf32>
    %93 = vector.extract_strided_slice %81 {offsets = [4, 0, 0], sizes = [2, 8, 8], strides = [1, 1, 1]} : vector<8x8x8xf32> to vector<2x8x8xf32>
    %94 = vector.shape_cast %93 : vector<2x8x8xf32> to vector<16x8xf32>
    %c16 = arith.constant 16 : index
    %c0_28 = arith.constant 0 : index
    %95 = vector.load %arg6[%c16, %c0_28] : memref<32x32xf32, #tpu.memory_space<vmem>>, vector<8x32xf32>
    %cst_29 = arith.constant dense<0.000000e+00> : vector<16x32xf32>
    %96 = tpu.matmul %94, %95, %cst_29 {dimension_numbers = #tpu.dot_dimension_numbers<[1], [0], [0], [1], [0, 0, 1, 1], [], []>} : vector<16x8xf32>, vector<8x32xf32>, vector<16x32xf32> -> vector<16x32xf32>
    %97 = arith.addf %92, %96 : vector<16x32xf32>
    %98 = vector.extract_strided_slice %81 {offsets = [6, 0, 0], sizes = [2, 8, 8], strides = [1, 1, 1]} : vector<8x8x8xf32> to vector<2x8x8xf32>
    %99 = vector.shape_cast %98 : vector<2x8x8xf32> to vector<16x8xf32>
    %c24 = arith.constant 24 : index
    %c0_30 = arith.constant 0 : index
    %100 = vector.load %arg6[%c24, %c0_30] : memref<32x32xf32, #tpu.memory_space<vmem>>, vector<8x32xf32>
    %cst_31 = arith.constant dense<0.000000e+00> : vector<16x32xf32>
    %101 = tpu.matmul %99, %100, %cst_31 {dimension_numbers = #tpu.dot_dimension_numbers<[1], [0], [0], [1], [0, 0, 1, 1], [], []>} : vector<16x8xf32>, vector<8x32xf32>, vector<16x32xf32> -> vector<16x32xf32>
    %102 = arith.addf %97, %101 : vector<16x32xf32>
    %103 = arith.addf %0, %102 : vector<16x32xf32>
    %c0_32 = arith.constant 0 : index
    %c0_33 = arith.constant 0 : index
    %104 = vector.load %arg7[%c0_32, %c0_33] : memref<1x32xf32, #tpu.memory_space<vmem>>, vector<1x32xf32>
    %105 = vector.shape_cast %104 : vector<1x32xf32> to vector<32xf32>
    %106 = vector.shape_cast %105 : vector<32xf32> to vector<1x32xf32>
    %107 = vector.broadcast %106 : vector<1x32xf32> to vector<16x32xf32>
    %108 = arith.addf %103, %107 : vector<16x32xf32>
    %c0_34 = arith.constant 0 : index
    %c0_35 = arith.constant 0 : index
    %109 = vector.load %arg8[%c0_34, %c0_35] : memref<1x32xf32, #tpu.memory_space<vmem>>, vector<1x32xf32>
    %110 = vector.shape_cast %109 : vector<1x32xf32> to vector<32xf32>
    %c0_36 = arith.constant 0 : index
    %c0_37 = arith.constant 0 : index
    %111 = vector.load %arg9[%c0_36, %c0_37] : memref<1x32xf32, #tpu.memory_space<vmem>>, vector<1x32xf32>
    %112 = vector.shape_cast %111 : vector<1x32xf32> to vector<32xf32>
    %cst_38 = arith.constant dense<0.000000e+00> : vector<16xf32>
    %113 = vector.multi_reduction <add>, %108, %cst_38 [1] : vector<16x32xf32> to vector<16xf32>
    %114 = vector.shape_cast %113 : vector<16xf32> to vector<16x1xf32>
    %cst_39 = arith.constant 3.200000e+01 : f32
    %115 = vector.broadcast %cst_39 : f32 to vector<16x1xf32>
    %116 = arith.divf %114, %115 : vector<16x1xf32>
    %117 = vector.broadcast %116 : vector<16x1xf32> to vector<16x32xf32>
    %118 = arith.subf %108, %117 : vector<16x32xf32>
    %119 = arith.mulf %118, %118 : vector<16x32xf32>
    %cst_40 = arith.constant dense<0.000000e+00> : vector<16xf32>
    %120 = vector.multi_reduction <add>, %119, %cst_40 [1] : vector<16x32xf32> to vector<16xf32>
    %121 = vector.shape_cast %120 : vector<16xf32> to vector<16x1xf32>
    %cst_41 = arith.constant 3.200000e+01 : f32
    %122 = vector.broadcast %cst_41 : f32 to vector<16x1xf32>
    %123 = arith.divf %121, %122 : vector<16x1xf32>
    %124 = vector.broadcast %116 : vector<16x1xf32> to vector<16x32xf32>
    %125 = arith.subf %108, %124 : vector<16x32xf32>
    %cst_42 = arith.constant 9.99999974E-6 : f32
    %126 = vector.broadcast %cst_42 : f32 to vector<16x1xf32>
    %127 = arith.addf %123, %126 : vector<16x1xf32>
    %128 = math.rsqrt %127 : vector<16x1xf32>
    %129 = vector.broadcast %128 : vector<16x1xf32> to vector<16x32xf32>
    %130 = arith.mulf %125, %129 : vector<16x32xf32>
    %131 = vector.shape_cast %110 : vector<32xf32> to vector<1x32xf32>
    %132 = vector.broadcast %131 : vector<1x32xf32> to vector<16x32xf32>
    %133 = arith.mulf %130, %132 : vector<16x32xf32>
    %134 = vector.shape_cast %112 : vector<32xf32> to vector<1x32xf32>
    %135 = vector.broadcast %134 : vector<1x32xf32> to vector<16x32xf32>
    %136 = arith.addf %133, %135 : vector<16x32xf32>
    %c0_43 = arith.constant 0 : index
    %c0_44 = arith.constant 0 : index
    %137 = vector.load %arg10[%c0_43, %c0_44] : memref<32x128xf32, #tpu.memory_space<vmem>>, vector<32x128xf32>
    %cst_45 = arith.constant dense<0.000000e+00> : vector<16x128xf32>
    %138 = tpu.matmul %136, %137, %cst_45 {dimension_numbers = #tpu.dot_dimension_numbers<[1], [0], [0], [1], [0, 0, 1, 1], [], []>} : vector<16x32xf32>, vector<32x128xf32>, vector<16x128xf32> -> vector<16x128xf32>
    %c0_46 = arith.constant 0 : index
    %c0_47 = arith.constant 0 : index
    %139 = vector.load %arg11[%c0_46, %c0_47] : memref<1x128xf32, #tpu.memory_space<vmem>>, vector<1x128xf32>
    %140 = vector.shape_cast %139 : vector<1x128xf32> to vector<128xf32>
    %141 = vector.shape_cast %140 : vector<128xf32> to vector<1x128xf32>
    %142 = vector.broadcast %141 : vector<1x128xf32> to vector<16x128xf32>
    %143 = arith.addf %138, %142 : vector<16x128xf32>
    %cst_48 = arith.constant 5.000000e-01 : f32
    %144 = vector.broadcast %cst_48 : f32 to vector<16x128xf32>
    %145 = arith.mulf %144, %143 : vector<16x128xf32>
    %146 = arith.mulf %143, %143 : vector<16x128xf32>
    %147 = arith.mulf %143, %146 : vector<16x128xf32>
    %cst_49 = arith.constant 4.471500e-02 : f32
    %148 = vector.broadcast %cst_49 : f32 to vector<16x128xf32>
    %149 = arith.mulf %148, %147 : vector<16x128xf32>
    %150 = arith.addf %143, %149 : vector<16x128xf32>
    %cst_50 = arith.constant 0.797884583 : f32
    %151 = vector.broadcast %cst_50 : f32 to vector<16x128xf32>
    %152 = arith.mulf %151, %150 : vector<16x128xf32>
    %153 = math.tanh %152 : vector<16x128xf32>
    %cst_51 = arith.constant 1.000000e+00 : f32
    %154 = vector.broadcast %cst_51 : f32 to vector<16x128xf32>
    %155 = arith.addf %154, %153 : vector<16x128xf32>
    %156 = arith.mulf %145, %155 : vector<16x128xf32>
    %c0_52 = arith.constant 0 : index
    %c0_53 = arith.constant 0 : index
    %157 = vector.load %arg12[%c0_52, %c0_53] : memref<128x32xf32, #tpu.memory_space<vmem>>, vector<128x32xf32>
    %cst_54 = arith.constant dense<0.000000e+00> : vector<16x32xf32>
    %158 = tpu.matmul %156, %157, %cst_54 {dimension_numbers = #tpu.dot_dimension_numbers<[1], [0], [0], [1], [0, 0, 1, 1], [], []>} : vector<16x128xf32>, vector<128x32xf32>, vector<16x32xf32> -> vector<16x32xf32>
    %c0_55 = arith.constant 0 : index
    %c0_56 = arith.constant 0 : index
    %159 = vector.load %arg13[%c0_55, %c0_56] : memref<1x32xf32, #tpu.memory_space<vmem>>, vector<1x32xf32>
    %160 = vector.shape_cast %159 : vector<1x32xf32> to vector<32xf32>
    %161 = vector.shape_cast %160 : vector<32xf32> to vector<1x32xf32>
    %162 = vector.broadcast %161 : vector<1x32xf32> to vector<16x32xf32>
    %163 = arith.addf %158, %162 : vector<16x32xf32>
    %164 = arith.addf %108, %163 : vector<16x32xf32>
    %c0_57 = arith.constant 0 : index
    %c0_58 = arith.constant 0 : index
    %165 = vector.load %arg14[%c0_57, %c0_58] : memref<16x32xf32, #tpu.memory_space<vmem>>, vector<16x32xf32>
    tpu.vector_store %arg14[%c0_57, %c0_58], %164 {strides = array<i32>} : memref<16x32xf32, #tpu.memory_space<vmem>>, vector<16x32xf32>,
    return
  }
}

</mosaic_0001>

<bundles_post_ra>
// kernel: tpu_custom_call.1
= control target key start
LH: loop header
LB: loop body
LE: loop exit
PB: predicated region body
PF: predicated region fallthrough
CT: control target
= control target key end

     0   :  { %19 = vsyncpa [#allocation3], 0  ;;  %s1617_s0 = inlined_call_operand.hbm [shape: f32[16,32], index: 0, kind: input, shape index: {}]   ;;  %s1618_s1 = inlined_call_operand.vmem [shape: f32[8,8,8], index: 1, kind: input, shape index: {}]   ;;  %s1619_s2 = inlined_call_operand.vmem [shape: f32[1,32], index: 2, kind: input, shape index: {}]   ;;  %s1620_s3 = inlined_call_operand.hbm [shape: f32[1,32], index: 3, kind: input, shape index: {}]   ;;  %s1621_s4 = inlined_call_operand.vmem [shape: f32[32,96], index: 4, kind: input, shape index: {}]   ;;  %s1622_s5 = inlined_call_operand.vmem [shape: f32[1,96], index: 5, kind: input, shape index: {}]   ;;  %s1623_s6 = inlined_call_operand.vmem [shape: f32[32,32], index: 6, kind: input, shape index: {}]   ;;  %s1624_s7 = inlined_call_operand.vmem [shape: f32[1,32], index: 7, kind: input, shape index: {}]   ;;  %s1625_s8 = inlined_call_operand.vmem [shape: f32[1,32], index: 8, kind: input, shape index: {}]   ;;  %s1626_s9 = inlined_call_operand.vmem [shape: f32[1,32], index: 9, kind: input, shape index: {}]   ;;  %s1627_s10 = inlined_call_operand.vmem [shape: f32[32,128], index: 10, kind: input, shape index: {}]   ;;  %s1628_s11 = inlined_call_operand.vmem [shape: f32[1,128], index: 11, kind: input, shape index: {}]   ;;  %s1629_s12 = inlined_call_operand.vmem [shape: f32[128,32], index: 12, kind: input, shape index: {}]   ;;  %s1630_s13 = inlined_call_operand.vmem [shape: f32[1,32], index: 13, kind: input, shape index: {}]   ;;  %s1631_s14 = inlined_call_operand.hbm [shape: f32[16,32], index: 14, kind: output, shape index: {}]  }
   0x1   :  { %20 = vsyncpa [#allocation6], 0 }
   0x2   :  { %21 = vsyncpa [#allocation4], 0  ;;  %s26_s15 = sshll.u32 %s1617_s0, 4  ;;  %s1232_s16 = smov [#allocation2]   ;;  %s27_s15 = int_to_ptr.hbm [resolvable:$true] %s26_s15 }
   0x3   :  { %s28_s17 = sshll.u32 %s1232_s16, 4  ;;  %s44_s20 = sshll.u32 %s1620_s3, 4  ;;  %s29_s17 = int_to_ptr.vmem [resolvable:$true] %s28_s17  ;;  %s45_s20 = int_to_ptr.hbm [resolvable:$true] %s44_s20 }
   0x4   :  { %s1233_s21 = smov 128   ;;  %s1234_s22 = smov 8  }
   0x5   :  { %34 = dma.hbm_to_vmem [thread:$0]  %s27_s15, 256, %s29_s17, [#allocation3], %s1233_s21, %s1233_s21, %s1234_s22  }
   0x6   :  { %s1235_s23 = smov [#allocation5]  }
   0x7   :  { %s46_s24 = sshll.u32 %s1235_s23, 4  ;;  %s47_s24 = int_to_ptr.vmem [resolvable:$true] %s46_s24 }
   0x8   :  { %49 = dma.hbm_to_vmem [thread:$0]  %s45_s20, 16, %s47_s24, [#allocation6]  }
   0x9   :  { %1226 = dma.done.wait [#allocation3], 256  }
   0xa   :  { %1227 = vsyncadd [#allocation3], 4294967040 }
   0xb   :  { %1228 = dma.done.wait [#allocation6], 16  }
   0xc   :  { %1229 = vsyncadd [#allocation6], 4294967280  ;;  %vm82_vm0 = vcmask 261120   ;;  %v1327_v0 = vld [vmem:[#allocation2] sm:$0xff]  ;;  %v1331_v2 = vld [vmem:[#allocation2 + $0x8] sm:$0xff]  ;;  %v1236_v4 = vmov 32.0  }
   0xd   :  { %v83_v1 = vsel %vm82_vm0, %v1327_v0, 0.0  ;;  %v86_v3 = vsel %vm82_vm0, %v1331_v2, 0.0  ;;  %1108 = vrcp.f32 %v1236_v4  ;;  %v147_v21 = vld [vmem:[%s1621_s4 + $0x18] sm:$0xff]  ;;  %v146_v22 = vld [vmem:[%s1621_s4 + $0x10] sm:$0xff]  ;;  %v145_v23 = vld [vmem:[%s1621_s4 + $0x8] sm:$0xff]  ;;  %s1237_s17 = smov 120  }
   0xe   :  { %84 = vadd.xlane.f32.xlu0 %v83_v1  ;;  %170 = vmatpush.msra.mxu1 %v147_v21  ;;  %v144_v24 = vld [vmem:[%s1621_s4] sm:$0xff]  ;;  %v1101_v43 = vld [vmem:[#allocation5] ss:$0 sm:$0xff]  ;;  %s1238_s18 = smov 112   ;;  %s1239_s19 = smov 104   ;;  %vm197_vm8 = vcmask 64512  }
   0xf   :  { %1070 = vmatpush.msra.mxu2 %v147_v21  ;;  %v1100_v39 = vld [vmem:[%s1619_s2] ss:$0 sm:$0xff]  ;;  %s1242_s0 = smov [#allocation7]  }
  0x10   :  { %171 = vmatpush.msra.mxu1 %v146_v22  ;;  %v1102_v53 = vld [vmem:[%s1622_s5] ss:$0 sm:$0xff]  ;;  %s1240_s5 = smov 96   ;;  %s1018_s3 = sshll.u32 %s1242_s0, 4  ;;  %s1019_s3 = int_to_ptr.vmem [resolvable:$true] %s1018_s3 }
  0x11   :  { %1071 = vmatpush.msra.mxu2 %v146_v22  ;;  %v414_v22 = vld [vmem:[%s1618_s1 + $0x10] sm:$0xff] }
  0x12   :  { %172 = vmatpush.msra.mxu1 %v145_v23 }
  0x13   :  { %v1109_v5 = vpop.eup %1108  ;;  %1072 = vmatpush.msra.mxu2 %v145_v23 }
  0x14   :  { %v90_v6 = vmul.f32 32.0, %v1109_v5  ;;  %vm94_vm1 = vweird.f32 %v1109_v5  ;;  %173 = vmatpush.msra.mxu1 %v144_v24 }
  0x15   :  { %1073 = vmatpush.msra.mxu2 %v144_v24 }
  0x16   :  { %87 = vadd.xlane.f32.xlu0 %v86_v3  ;;  %v91_v7 = vsub.f32 1.0, %v90_v6 }
  0x18   :  { %v92_v8 = vmul.f32 %v1109_v5, %v91_v7 }
  0x1a   :  { %v93_v9 = vadd.f32 %v1109_v5, %v92_v8 }
  0x1c   :  { %v1335_v10 = vsel %vm94_vm1, %v1109_v5, %v93_v9 }
  0x81   :  { %v85_v11 = vpop.xlane.xlu0 %84 }
  0x82   :  { %v96_v12 = vmul.f32 %v1335_v10, %v85_v11 }
  0x84   :  { %v98_v13 = vsub.f32 %v1327_v0, %v96_v12  ;;  %v412_v12 = vld [vmem:[%s1618_s1] sm:$0xff] }
  0x86   :  { %v100_v14 = vmul.f32 %v98_v13, %v98_v13 }
  0x88   :  { %v102_v15 = vsel %vm82_vm0, %v100_v14, 0.0 }
  0x89   :  { %103 = vadd.xlane.f32.xlu1 %v102_v15  ;;  %v88_v16 = vpop.xlane.xlu0 %87 }
  0x8a   :  { %v97_v17 = vmul.f32 %v1335_v10, %v88_v16 }
  0x8c   :  { %v99_v18 = vsub.f32 %v1331_v2, %v97_v17 }
  0x8e   :  { %v101_v19 = vmul.f32 %v99_v18, %v99_v18 }
  0x90   :  { %v105_v20 = vsel %vm82_vm0, %v101_v19, 0.0 }
  0x91   :  { %106 = vadd.xlane.f32.xlu1 %v105_v20 }
  0xfc   :  { %v104_v25 = vpop.xlane.xlu1 %103 }
  0xfd   :  { %v108_v26 = vmul.f32 %v104_v25, %v1335_v10 }
  0xff   :  { %v110_v27 = vadd.f32 1e-05, %v108_v26 }
 0x101   :  { %1110 = vrsqrt.f32 %v110_v27  ;;  %vm118_vm3 = vweird.f32 %v110_v27 }
 0x104   :  { %v107_v28 = vpop.xlane.xlu1 %106 }
 0x105   :  { %v109_v29 = vmul.f32 %v107_v28, %v1335_v10 }
 0x107   :  { %v1111_v30 = vpop.eup %1110  ;;  %v111_v31 = vadd.f32 1e-05, %v109_v29 }
 0x108   :  { %v113_v32 = vmul.f32 %v1111_v30, %v110_v27  ;;  %vm119_vm2 = vweird.f32 %v1111_v30  ;;  %v416_v27 = vld [vmem:[%s1618_s1 + $0x20] sm:$0xff] }
 0x109   :  { %1112 = vrsqrt.f32 %v111_v31  ;;  %vm120_vm4 = vmor %vm118_vm3, %vm119_vm2  ;;  %vm128_vm6 = vweird.f32 %v111_v31 }
 0x10a   :  { %v114_v33 = vmul.f32 %v1111_v30, %v113_v32  ;;  %v415_v32 = vld [vmem:[%s1618_s1 + $0x18] sm:$0xff] }
 0x10c   :  { %v115_v34 = vmul.f32 0.5, %v114_v33 }
 0x10e   :  { %v116_v35 = vsub.f32 1.5, %v115_v34 }
 0x10f   :  { %v1113_v36 = vpop.eup %1112 }
 0x110   :  { %v117_v37 = vmul.f32 %v1111_v30, %v116_v35  ;;  %v123_v38 = vmul.f32 %v1113_v36, %v111_v31  ;;  %vm129_vm5 = vweird.f32 %v1113_v36 }
 0x111   :  { %vm130_vm7 = vmor %vm128_vm6, %vm129_vm5 }
 0x112   :  { %v121_v40 = vsel %vm120_vm4, %v1111_v30, %v117_v37  ;;  %v124_v41 = vmul.f32 %v1113_v36, %v123_v38  ;;  %v418_v37 = vld [vmem:[%s1618_s1 + $0x30] sm:$0xff] }
 0x113   :  { %v132_v42 = vmul.f32 %v121_v40, %v98_v13 }
 0x114   :  { %v125_v44 = vmul.f32 0.5, %v124_v41 }
 0x115   :  { %v137_v45 = vmul.f32 %v1100_v39, %v132_v42 }
 0x116   :  { %v126_v46 = vsub.f32 1.5, %v125_v44 }
 0x117   :  { %v142_v47 = vadd.f32 %v1101_v43, %v137_v45 }
 0x118   :  { %v127_v48 = vmul.f32 %v1113_v36, %v126_v46 }
 0x119   :  { %1034 = vmatmul.msk.f32.vlgmr.msra.gmra.mxu1 %vm82_vm0, %v142_v47 }
 0x11a   :  { %v131_v49 = vsel %vm130_vm7, %v1113_v36, %v127_v48 }
 0x11b   :  { %v133_v50 = vmul.f32 %v131_v49, %v99_v18  ;;  %v413_v18 = vld [vmem:[%s1618_s1 + $0x8] sm:$0xff] }
 0x11d   :  { %v138_v51 = vmul.f32 %v1100_v39, %v133_v50 }
 0x11f   :  { %v143_v52 = vadd.f32 %v1101_v43, %v138_v51  ;;  %v417_v43 = vld [vmem:[%s1618_s1 + $0x28] sm:$0xff] }
 0x121   :  { %1035 = vmatmul.msk.f32.vlgmr.msra.gmra.mxu2 %vm82_vm0, %v143_v52 }
 0x196   :  { %v175_v54 = vpop.f32.mrf.mxu1 }
 0x197   :  { %v1365_v55 = vadd.f32 %v1102_v53, %v175_v54 }
 0x199   :  { %183 = vrot.lane.b32.xlu2 %v1365_v55, %s1237_s17 }
 0x1a1   :  { %187 = vrot.lane.b32.xlu2 %v1365_v55, %s1238_s18 }
 0x1a4   :  { %v178_v56 = vpop.f32.mrf.mxu2 }
 0x1a5   :  { %v1369_v57 = vadd.f32 %v1102_v53, %v178_v56  ;;  %v419_v56 = vld [vmem:[%s1618_s1 + $0x38] sm:$0xff] }
 0x1a7   :  { %193 = vrot.lane.b32.xlu1 %v1369_v57, %s1239_s19  ;;  %185 = vrot.lane.b32.xlu0 %v1369_v57, %s1237_s17 }
 0x1a9   :  { %191 = vrot.lane.b32.xlu2 %v1365_v55, %s1239_s19 }
 0x1af   :  { %195 = vrot.lane.b32.xlu0 %v1365_v55, %s1240_s5 }
 0x1b1   :  { %189 = vrot.lane.b32.xlu2 %v1369_v57, %s1238_s18  ;;  %s1241_s18 = smov 64  }
 0x1b9   :  { %222 = vrot.lane.b32.xlu2 %v1369_v57, %s1240_s5 }
 0x1f3   :  { %v1377_v58 = vpop.permute.xlu2 %183 }
 0x1f4   :  { %248 = vrot.lane.b32.xlu2 %v1377_v58, %s1240_s5 }
 0x1fb   :  { %v1380_v59 = vpop.permute.xlu2 %187 }
 0x1fc   :  { %300 = vrot.lane.b32.xlu1 %v1380_v59, %s1240_s5 }
 0x203   :  { %v1383_v60 = vpop.permute.xlu2 %191 }
 0x204   :  { %352 = vrot.lane.b32.xlu1 %v1383_v60, %s1240_s5 }
 0x20b   :  { %v1386_v61 = vpop.permute.xlu2 %189 }
 0x213   :  { %v223_v62 = vpop.permute.xlu2 %222 }
 0x214   :  { %1038 = vmatpush.xpose.msk.msrb.mxu2 %vm197_vm8, %v223_v62 }
 0x217   :  { %1039 = vmatmul.msk.f32.vlgmr.msrb.gmra.mxu2 %vm197_vm8, %v1369_v57 }
 0x219   :  { %v1391_v63 = vpop.permute.xlu1 %193  ;;  %v1393_v1 = vpop.permute.xlu0 %185 }
 0x21a   :  { %378 = vrot.lane.b32.xlu2 %v1391_v63, %s1240_s5  ;;  %274 = vrot.lane.b32.xlu0 %v1393_v1, %s1240_s5 }
 0x221   :  { %v196_v3 = vpop.permute.xlu0 %195 }
 0x222   :  { %326 = vrot.lane.b32.xlu0 %v1386_v61, %s1240_s5  ;;  %1036 = vmatpush.xpose.msk.msrb.mxu1 %vm197_vm8, %v196_v3 }
 0x225   :  { %1037 = vmatmul.msk.f32.vlgmr.msrb.gmra.mxu1 %vm197_vm8, %v1365_v55 }
 0x24e   :  { %v249_v4 = vpop.permute.xlu2 %248 }
 0x24f   :  { %1040 = vmatpush.xpose.msk.msra.mxu3 %vm197_vm8, %v249_v4 }
 0x252   :  { %1041 = vmatmul.msk.f32.vlgmr.msra.gmra.mxu3 %vm197_vm8, %v1377_v58 }
 0x26e   :  { %v301_v5 = vpop.permute.xlu1 %300 }
 0x26f   :  { %1044 = vmatpush.xpose.msk.msra.mxu2 %vm197_vm8, %v301_v5 }
 0x272   :  { %1045 = vmatmul.msk.f32.vlgmr.msra.gmra.mxu2 %vm197_vm8, %v1380_v59 }
 0x274   :  { %v379_v6 = vpop.permute.xlu2 %378 }
 0x275   :  { %1050 = vmatpush.xpose.msk.msrb.mxu2 %vm197_vm8, %v379_v6 }
 0x276   :  { %v353_v8 = vpop.permute.xlu1 %352 }
 0x27a   :  { %1051 = vmatmul.msk.f32.vlgmr.msrb.gmra.mxu2 %vm197_vm8, %v1391_v63 }
 0x28c   :  { %v275_v7 = vpop.permute.xlu0 %274 }
 0x28d   :  { %1042 = vmatpush.xpose.msk.msra.mxu1 %vm197_vm8, %v275_v7  ;;  %v1090_v7 = vpack.i.bf16 %v1380_v59, %v1393_v1  ;;  %v1085_v59 = vpack.i.bf16 %v1377_v58, %v1365_v55 }
 0x290   :  { %1043 = vmatmul.msk.f32.vlgmr.msra.gmra.mxu1 %vm197_vm8, %v1393_v1 }
 0x291   :  { %1048 = vmatpush.xpose.msk.msrb.mxu1 %vm197_vm8, %v353_v8  ;;  %v1095_v8 = vpack.i.bf16 %v1391_v63, %v1383_v60 }
 0x294   :  { %v327_v9 = vpop.permute.xlu0 %326 }
 0x295   :  { %1046 = vmatpush.xpose.msk.msrb.mxu3 %vm197_vm8, %v327_v9 }
 0x298   :  { %1047 = vmatmul.msk.f32.vlgmr.msrb.gmra.mxu3 %vm197_vm8, %v1386_v61  ;;  %1049 = vmatmul.msk.f32.vlgmr.msrb.gmra.mxu1 %vm197_vm8, %v1383_v60 }
 0x29a   :  { %v245_v14 = vpop.f32.mrf.mxu2 }
 0x29b   :  { %v405_v16 = vmul.f32 0.35355338, %v245_v14 }
 0x29d   :  { %v421_v19 = vadd.f32 %v413_v18, %v405_v16 }
 0x29f   :  { %v431_v20 = vsel %vm197_vm8, %v421_v19, -inf }
 0x2a2   :  { %v219_v11 = vpop.f32.mrf.mxu1 }
 0x2a3   :  { %v404_v13 = vmul.f32 0.35355338, %v219_v11 }
 0x2a5   :  { %v420_v15 = vadd.f32 %v412_v12, %v404_v13 }
 0x2a7   :  { %v428_v17 = vsel %vm197_vm8, %v420_v15, -inf }
 0x2a8   :  { %429 = vmax.xlane.f32.xlu2 %v428_v17 }
 0x2b0   :  { %432 = vmax.xlane.f32.xlu2 %v431_v20 }
 0x2d5   :  { %v271_v21 = vpop.f32.mrf.mxu3 }
 0x2d6   :  { %v406_v23 = vmul.f32 0.35355338, %v271_v21 }
 0x2d8   :  { %v422_v24 = vadd.f32 %v414_v22, %v406_v23 }
 0x2da   :  { %v434_v25 = vsel %vm197_vm8, %v422_v24, -inf }
 0x2db   :  { %435 = vmax.xlane.f32.xlu1 %v434_v25 }
 0x2f5   :  { %v323_v26 = vpop.f32.mrf.mxu2 }
 0x2f6   :  { %v408_v28 = vmul.f32 0.35355338, %v323_v26 }
 0x2f8   :  { %v424_v29 = vadd.f32 %v416_v27, %v408_v28 }
 0x2fa   :  { %v440_v30 = vsel %vm197_vm8, %v424_v29, -inf }
 0x2fb   :  { %441 = vmax.xlane.f32.xlu2 %v440_v30 }
 0x2fd   :  { %v401_v50 = vpop.f32.mrf.mxu2 }
 0x2fe   :  { %v411_v53 = vmul.f32 0.35355338, %v401_v50 }
 0x300   :  { %v427_v3 = vadd.f32 %v419_v56, %v411_v53 }
 0x302   :  { %v449_v4 = vsel %vm197_vm8, %v427_v3, -inf }
 0x30d   :  { %v297_v31 = vpop.f32.mrf.mxu1 }
 0x30e   :  { %v407_v33 = vmul.f32 0.35355338, %v297_v31 }
 0x310   :  { %v423_v34 = vadd.f32 %v415_v32, %v407_v33 }
 0x312   :  { %v437_v35 = vsel %vm197_vm8, %v423_v34, -inf }
 0x313   :  { %438 = vmax.xlane.f32.xlu0 %v437_v35 }
 0x315   :  { %v375_v36 = vpop.f32.mrf.mxu1 }
 0x316   :  { %v410_v38 = vmul.f32 0.35355338, %v375_v36 }
 0x318   :  { %v426_v39 = vadd.f32 %v418_v37, %v410_v38 }
 0x31a   :  { %v446_v40 = vsel %vm197_vm8, %v426_v39, -inf }
 0x31b   :  { %v430_v41 = vpop.xlane.xlu2 %429  ;;  %447 = vmax.xlane.f32.xlu1 %v446_v40  ;;  %v349_v42 = vpop.f32.mrf.mxu3 }
 0x31c   :  { %v452_v44 = vsub.f32 %v420_v15, %v430_v41  ;;  %v409_v45 = vmul.f32 0.35355338, %v349_v42 }
 0x31e   :  { %v460_v46 = vmul.f32 1.442695, %v452_v44  ;;  %v425_v47 = vadd.f32 %v417_v43, %v409_v45 }
 0x320   :  { %1114 = vpow2.f32 %v460_v46  ;;  %v443_v48 = vsel %vm197_vm8, %v425_v47, -inf }
 0x323   :  { %v433_v49 = vpop.xlane.xlu2 %432  ;;  %444 = vmax.xlane.f32.xlu1 %v443_v48 }
 0x324   :  { %v453_v52 = vsub.f32 %v421_v19, %v433_v49 }
 0x326   :  { %v1447_v51 = vpop.eup %1114  ;;  %v462_v62 = vmul.f32 1.442695, %v453_v52 }
 0x327   :  { %v476_v54 = vsel %vm197_vm8, %v1447_v51, 0.0 }
 0x328   :  { %477 = vadd.xlane.f32.xlu0 %v476_v54  ;;  %1116 = vpow2.f32 %v462_v62 }
 0x32e   :  { %v1455_v5 = vpop.eup %1116 }
 0x32f   :  { %v479_v6 = vsel %vm197_vm8, %v1455_v5, 0.0 }
 0x330   :  { %450 = vmax.xlane.f32.xlu0 %v449_v4 }
 0x338   :  { %480 = vadd.xlane.f32.xlu0 %v479_v6 }
 0x33c   :  { %1091 = vrot.lane.b32.xlu1 %v1090_v7, %s1241_s18 }
 0x34c   :  { %1096 = vrot.lane.b32.xlu0 %v1095_v8, %s1241_s18 }
 0x34e   :  { %v436_v9 = vpop.xlane.xlu1 %435 }
 0x34f   :  { %v454_v11 = vsub.f32 %v422_v24, %v436_v9 }
 0x351   :  { %v464_v12 = vmul.f32 1.442695, %v454_v11 }
 0x353   :  { %1118 = vpow2.f32 %v464_v12 }
 0x359   :  { %v1119_v13 = vpop.eup %1118 }
 0x35a   :  { %v482_v14 = vsel %vm197_vm8, %v1119_v13, 0.0 }
 0x35b   :  { %483 = vadd.xlane.f32.xlu2 %v482_v14 }
 0x36e   :  { %v442_v15 = vpop.xlane.xlu2 %441 }
 0x36f   :  { %v456_v16 = vsub.f32 %v424_v29, %v442_v15 }
 0x371   :  { %v468_v1 = vmul.f32 1.442695, %v456_v16  ;;  %v725_v16 = vld [vmem:[%s1623_s6 + $0x8] sm:$0xff] }
 0x373   :  { %1120 = vpow2.f32 %v468_v1  ;;  %1086 = vrot.lane.b32.xlu2 %v1085_v59, %s1241_s18  ;;  %v784_v1 = vld [vmem:[%s1623_s6 + $0x10] sm:$0xff] }
 0x379   :  { %v1121_v60 = vpop.eup %1120 }
 0x37a   :  { %v488_v63 = vsel %vm197_vm8, %v1121_v60, 0.0 }
 0x37b   :  { %489 = vadd.xlane.f32.xlu0 %v488_v63  ;;  %v816_v63 = vld [vmem:[%s1623_s6 + $0x18] sm:$0xff] }
 0x386   :  { %v439_v17 = vpop.xlane.xlu0 %438 }
 0x387   :  { %v455_v18 = vsub.f32 %v423_v34, %v439_v17 }
 0x389   :  { %v466_v19 = vmul.f32 1.442695, %v455_v18 }
 0x38b   :  { %1122 = vpow2.f32 %v466_v19 }
 0x38e   :  { %v448_v20 = vpop.xlane.xlu1 %447 }
 0x38f   :  { %v458_v21 = vsub.f32 %v426_v39, %v448_v20 }
 0x391   :  { %v1123_v22 = vpop.eup %1122  ;;  %v472_v23 = vmul.f32 1.442695, %v458_v21 }
 0x392   :  { %v485_v24 = vsel %vm197_vm8, %v1123_v22, 0.0 }
 0x393   :  { %1124 = vpow2.f32 %v472_v23  ;;  %486 = vadd.xlane.f32.xlu1 %v485_v24 }
 0x396   :  { %v445_v55 = vpop.xlane.xlu1 %444 }
 0x397   :  { %v457_v58 = vsub.f32 %v425_v47, %v445_v55 }
 0x399   :  { %v1125_v25 = vpop.eup %1124  ;;  %v470_v26 = vmul.f32 1.442695, %v457_v58 }
 0x39a   :  { %v494_v27 = vsel %vm197_vm8, %v1125_v25, 0.0 }
 0x39b   :  { %1126 = vpow2.f32 %v470_v26  ;;  %495 = vadd.xlane.f32.xlu1 %v494_v27  ;;  %v478_v28 = vpop.xlane.xlu0 %477 }
 0x3a1   :  { %v1472_v29 = vpop.eup %1126 }
 0x3a2   :  { %v491_v30 = vsel %vm197_vm8, %v1472_v29, 0.0 }
 0x3a3   :  { %492 = vadd.xlane.f32.xlu2 %v491_v30  ;;  %v451_v31 = vpop.xlane.xlu0 %450 }
 0x3a4   :  { %v459_v32 = vsub.f32 %v427_v3, %v451_v31 }
 0x3a6   :  { %v474_v33 = vmul.f32 1.442695, %v459_v32 }
 0x3a8   :  { %1128 = vpow2.f32 %v474_v33 }
 0x3a9   :  { %1130 = vrcp.f32 %v478_v28  ;;  %v1103_v28 = vld [vmem:[%s1624_s7] ss:$0 sm:$0xff]  ;;  %s1020_s7 = sshll.u32 %s1631_s14, 4  ;;  %s1021_s7 = int_to_ptr.hbm [resolvable:$true] %s1020_s7 }
 0x3ab   :  { %v481_v38 = vpop.xlane.xlu0 %480 }
 0x3ae   :  { %v1129_v34 = vpop.eup %1128  ;;  %v1092_v35 = vpop.permute.xlu1 %1091 }
 0x3af   :  { %v1093_v36 = vunpack.i.l.bf16 %v1092_v35  ;;  %v497_v37 = vsel %vm197_vm8, %v1129_v34, 0.0  ;;  %v1131_v42 = vpop.eup %1130  ;;  %v1094_v49 = vunpack.i.h.bf16 %v1092_v35 }
 0x3b0   :  { %498 = vadd.xlane.f32.xlu0 %v497_v37  ;;  %v508_v47 = vmul.f32 %v1131_v42, %v1447_v51 }
 0x3b1   :  { %615 = vmatpush.msra.mxu2 %v1093_v36 }
 0x3b4   :  { %542 = vrot.lane.b32.xlu1 %v1369_v57, %s1241_s18 }
 0x3be   :  { %v1097_v39 = vpop.permute.xlu0 %1096 }
 0x3bf   :  { %v1099_v40 = vunpack.i.h.bf16 %v1097_v39  ;;  %v1098_v57 = vunpack.i.l.bf16 %v1097_v39 }
 0x3c1   :  { %719 = vmatpush.msrb.mxu2 %v1099_v40 }
 0x3c4   :  { %646 = vrot.lane.b32.xlu0 %v1386_v61, %s1241_s18 }
 0x3ce   :  { %v484_v41 = vpop.xlane.xlu2 %483 }
 0x3cf   :  { %1132 = vrcp.f32 %v484_v41 }
 0x3d5   :  { %v1133_v43 = vpop.eup %1132 }
 0x3d6   :  { %v1087_v44 = vpop.permute.xlu2 %1086  ;;  %v510_v48 = vmul.f32 %v1133_v43, %v1119_v13 }
 0x3d7   :  { %v1089_v45 = vunpack.i.h.bf16 %v1087_v44  ;;  %v1088_v46 = vunpack.i.l.bf16 %v1087_v44 }
 0x3d9   :  { %537 = vmatpush.msra.mxu3 %v1088_v46  ;;  %589 = vmatpush.msra.mxu1 %v1089_v45 }
 0x3da   :  { %1052 = vmatmul.msk.f32.vlgmr.msra.gmra.mxu3 %vm197_vm8, %v508_v47  ;;  %1054 = vmatmul.msk.f32.vlgmr.msra.gmra.mxu1 %vm197_vm8, %v510_v48 }
 0x3db   :  { %641 = vmatpush.msrb.mxu3 %v1094_v49  ;;  %693 = vmatpush.msrb.mxu1 %v1098_v57  ;;  %v915_v57 = vld [vmem:[%s1627_s10 + $0x18] sm:$0xff] }
 0x3dd   :  { %747 = vmatpush.msra.mxu3 %v725_v16  ;;  %806 = vmatpush.msra.mxu1 %v784_v1 }
 0x3ee   :  { %v490_v61 = vpop.xlane.xlu0 %489 }
 0x3ef   :  { %1134 = vrcp.f32 %v490_v61  ;;  %v914_v61 = vld [vmem:[%s1627_s10 + $0x10] sm:$0xff] }
 0x3f5   :  { %v1135_v50 = vpop.eup %1134 }
 0x3f6   :  { %v512_v52 = vmul.f32 %v1135_v50, %v1121_v60  ;;  %v913_v50 = vld [vmem:[%s1627_s10 + $0x8] sm:$0xff] }
 0x3f8   :  { %1056 = vmatmul.msk.f32.vlgmr.msrb.gmra.mxu3 %vm197_vm8, %v512_v52  ;;  %v912_v52 = vld [vmem:[%s1627_s10] sm:$0xff] }
 0x3f9   :  { %938 = vmatpush.msrb.mxu3 %v915_v57 }
 0x3fb   :  { %939 = vmatpush.msrb.mxu3 %v914_v61 }
 0x3fd   :  { %940 = vmatpush.msrb.mxu3 %v913_v50 }
 0x3ff   :  { %941 = vmatpush.msrb.mxu3 %v912_v52 }
 0x406   :  { %v487_v53 = vpop.xlane.xlu1 %486 }
 0x407   :  { %1136 = vrcp.f32 %v487_v53 }
 0x40d   :  { %v1137_v51 = vpop.eup %1136 }
 0x40e   :  { %v511_v54 = vmul.f32 %v1137_v51, %v1123_v22  ;;  %v496_v56 = vpop.xlane.xlu1 %495 }
 0x40f   :  { %1138 = vrcp.f32 %v496_v56 }
 0x410   :  { %1055 = vmatmul.msk.f32.vlgmr.msra.gmra.mxu2 %vm197_vm8, %v511_v54  ;;  %1140 = vrcp.f32 %v481_v38 }
 0x411   :  { %838 = vmatpush.msra.mxu2 %v816_v63 }
 0x415   :  { %v1139_v62 = vpop.eup %1138 }
 0x416   :  { %v514_v3 = vmul.f32 %v1139_v62, %v1125_v25  ;;  %v1141_v4 = vpop.eup %1140  ;;  %v493_v11 = vpop.xlane.xlu2 %492 }
 0x417   :  { %v509_v8 = vmul.f32 %v1141_v4, %v1455_v5  ;;  %v724_v5 = vld [vmem:[%s1623_s6] sm:$0xff] }
 0x418   :  { %1058 = vmatmul.msk.f32.vlgmr.msrb.gmra.mxu1 %vm197_vm8, %v514_v3 }
 0x423   :  { %v499_v6 = vpop.xlane.xlu0 %498 }
 0x424   :  { %1142 = vrcp.f32 %v499_v6 }
 0x425   :  { %1144 = vrcp.f32 %v493_v11 }
 0x426   :  { %v543_v7 = vpop.permute.xlu1 %542 }
 0x427   :  { %563 = vmatpush.msra.mxu0 %v543_v7 }
 0x428   :  { %1053 = vmatmul.msk.f32.vlgmr.msra.gmra.mxu0 %vm197_vm8, %v509_v8  ;;  %v1104_v8 = vld [vmem:[%s1625_s8] ss:$0 sm:$0xff] }
 0x42a   :  { %v1143_v9 = vpop.eup %1142 }
 0x42b   :  { %v515_v12 = vmul.f32 %v1143_v9, %v1129_v34  ;;  %v1145_v13 = vpop.eup %1144 }
 0x42c   :  { %v513_v15 = vmul.f32 %v1145_v13, %v1472_v29 }
 0x42d   :  { %1059 = vmatmul.msk.f32.vlgmr.msrb.gmra.mxu2 %vm197_vm8, %v515_v12  ;;  %v1105_v12 = vld [vmem:[%s1626_s9] ss:$0 sm:$0xff] }
 0x436   :  { %v647_v14 = vpop.permute.xlu0 %646 }
 0x437   :  { %667 = vmatpush.msrb.mxu0 %v647_v14  ;;  %v982_v14 = vld [vmem:[%s1629_s12 + $0x78] sm:$0xff] }
 0x438   :  { %1057 = vmatmul.msk.f32.vlgmr.msrb.gmra.mxu0 %vm197_vm8, %v513_v15  ;;  %v981_v15 = vld [vmem:[%s1629_s12 + $0x70] sm:$0xff] }
 0x439   :  { %776 = vmatpush.msra.mxu0 %v724_v5  ;;  %v980_v5 = vld [vmem:[%s1629_s12 + $0x68] sm:$0xff] }
 0x43b   :  { %987 = vmatpush.msrb.mxu0 %v982_v14 }
 0x43d   :  { %988 = vmatpush.msrb.mxu0 %v981_v15 }
 0x43f   :  { %989 = vmatpush.msrb.mxu0 %v980_v5 }
 0x457   :  { %v591_v59 = vpop.f32.mrf.mxu1 }
 0x458   :  { %1060 = vmatmul.msk.f32.vlgmr.msra.gmra.mxu3 %vm197_vm8, %v591_v59 }
 0x45d   :  { %v539_v60 = vpop.f32.mrf.mxu3 }
 0x45e   :  { %1062 = vmatmul.msk.f32.vlgmr.msra.gmra.mxu0 %vm197_vm8, %v539_v60  ;;  %v979_v60 = vld [vmem:[%s1629_s12 + $0x60] sm:$0xff] }
 0x45f   :  { %990 = vmatpush.msrb.mxu0 %v979_v60 }
 0x47b   :  { %v643_v17 = vpop.f32.mrf.mxu3 }
 0x47c   :  { %1064 = vmatmul.msk.f32.vlgmr.msra.gmra.mxu1 %vm197_vm8, %v643_v17 }
 0x493   :  { %v617_v18 = vpop.f32.mrf.mxu2 }
 0x494   :  { %1061 = vmatmul.msk.f32.gmra.mxu3 %vm197_vm8, %v617_v18 }
 0x495   :  { %v695_v19 = vpop.f32.mrf.mxu1 }
 0x496   :  { %1066 = vmatmul.msk.f32.vlgmr.msra.gmra.mxu2 %vm197_vm8, %v695_v19 }
 0x4a5   :  { %v565_v20 = vpop.f32.mrf.mxu0 }
 0x4a6   :  { %1063 = vmatmul.msk.f32.gmra.mxu0 %vm197_vm8, %v565_v20 }
 0x4b0   :  { %v721_v21 = vpop.f32.mrf.mxu2 }
 0x4b1   :  { %1067 = vmatmul.msk.f32.gmra.mxu2 %vm197_vm8, %v721_v21 }
 0x4b5   :  { %v669_v22 = vpop.f32.mrf.mxu0 }
 0x4b6   :  { %1065 = vmatmul.msk.f32.gmra.mxu1 %vm197_vm8, %v669_v22 }
 0x4db   :  { %v749_v23 = vpop.f32.mrf.mxu3  ;;  %v778_v24 = vpop.f32.mrf.mxu0 }
 0x4dc   :  { %v779_v58 = vadd.f32 %v778_v24, %v749_v23 }
 0x4f9   :  { %v808_v55 = vpop.f32.mrf.mxu1 }
 0x4fa   :  { %v814_v25 = vadd.f32 %v808_v55, %v779_v58  ;;  %v978_v58 = vld [vmem:[%s1629_s12 + $0x58] sm:$0xff] }
 0x4fb   :  { %991 = vmatpush.msrb.mxu0 %v978_v58 }
 0x517   :  { %v752_v33 = vpop.f32.mrf.mxu3 }
 0x519   :  { %v840_v26 = vpop.f32.mrf.mxu2 }
 0x51a   :  { %v846_v27 = vadd.f32 %v840_v26, %v814_v25  ;;  %v977_v25 = vld [vmem:[%s1629_s12 + $0x50] sm:$0xff]  ;;  %v976_v26 = vld [vmem:[%s1629_s12 + $0x48] sm:$0xff] }
 0x51b   :  { %992 = vmatpush.msrb.mxu0 %v977_v25 }
 0x51c   :  { %v848_v29 = vadd.f32 %v846_v27, %v1327_v0  ;;  %v975_v27 = vld [vmem:[%s1629_s12 + $0x40] sm:$0xff] }
 0x51d   :  { %993 = vmatpush.msrb.mxu0 %v976_v26 }
 0x51e   :  { %v1516_v30 = vadd.f32 %v1103_v28, %v848_v29  ;;  %v973_v29 = vld [vmem:[%s1629_s12 + $0x30] sm:$0xff] }
 0x51f   :  { %994 = vmatpush.msrb.mxu0 %v975_v27 }
 0x520   :  { %v858_v31 = vsel %vm82_vm0, %v1516_v30, 0.0 }
 0x521   :  { %859 = vadd.xlane.f32.xlu1 %v858_v31  ;;  %v972_v31 = vld [vmem:[%s1629_s12 + $0x28] sm:$0xff] }
 0x523   :  { %v781_v32 = vpop.f32.mrf.mxu0 }
 0x524   :  { %v782_v34 = vadd.f32 %v781_v32, %v752_v33  ;;  %v971_v32 = vld [vmem:[%s1629_s12 + $0x20] sm:$0xff]  ;;  %v970_v33 = vld [vmem:[%s1629_s12 + $0x18] sm:$0xff] }
 0x533   :  { %v811_v35 = vpop.f32.mrf.mxu1 }
 0x534   :  { %v815_v36 = vadd.f32 %v811_v35, %v782_v34  ;;  %v843_v37 = vpop.f32.mrf.mxu2  ;;  %v969_v34 = vld [vmem:[%s1629_s12 + $0x10] sm:$0xff]  ;;  %v968_v35 = vld [vmem:[%s1629_s12 + $0x8] sm:$0xff] }
 0x536   :  { %v847_v38 = vadd.f32 %v843_v37, %v815_v36  ;;  %v967_v36 = vld [vmem:[%s1629_s12] sm:$0xff] }
 0x537   :  { %v1106_v37 = vld [vmem:[%s1628_s11] ss:$0 sm:$0xff] }
 0x538   :  { %v849_v39 = vadd.f32 %v847_v38, %v1331_v2 }
 0x53a   :  { %v1521_v40 = vadd.f32 %v1103_v28, %v849_v39  ;;  %v974_v28 = vld [vmem:[%s1629_s12 + $0x38] sm:$0xff] }
 0x53b   :  { %995 = vmatpush.msrb.mxu0 %v974_v28 }
 0x53c   :  { %v861_v0 = vsel %vm82_vm0, %v1521_v40, 0.0 }
 0x53d   :  { %862 = vadd.xlane.f32.xlu0 %v861_v0  ;;  %996 = vmatpush.msrb.mxu0 %v973_v29 }
 0x53f   :  { %997 = vmatpush.msrb.mxu0 %v972_v31 }
 0x541   :  { %998 = vmatpush.msrb.mxu0 %v971_v32 }
 0x543   :  { %999 = vmatpush.msrb.mxu0 %v970_v33 }
 0x545   :  { %1000 = vmatpush.msrb.mxu0 %v969_v34 }
 0x547   :  { %1001 = vmatpush.msrb.mxu0 %v968_v35 }
 0x549   :  { %1002 = vmatpush.msrb.mxu0 %v967_v36 }
 0x594   :  { %v860_v41 = vpop.xlane.xlu1 %859 }
 0x595   :  { %v864_v42 = vmul.f32 %v860_v41, %v1335_v10 }
 0x597   :  { %v866_v43 = vsub.f32 %v1516_v30, %v864_v42 }
 0x599   :  { %v868_v44 = vmul.f32 %v866_v43, %v866_v43 }
 0x59b   :  { %v870_v45 = vsel %vm82_vm0, %v868_v44, 0.0 }
 0x59c   :  { %871 = vadd.xlane.f32.xlu2 %v870_v45 }
 0x5b0   :  { %v863_v46 = vpop.xlane.xlu0 %862 }
 0x5b1   :  { %v865_v47 = vmul.f32 %v863_v46, %v1335_v10 }
 0x5b3   :  { %v867_v2 = vsub.f32 %v1521_v40, %v865_v47 }
 0x5b5   :  { %v869_v48 = vmul.f32 %v867_v2, %v867_v2 }
 0x5b7   :  { %v873_v49 = vsel %vm82_vm0, %v869_v48, 0.0 }
 0x5b8   :  { %874 = vadd.xlane.f32.xlu2 %v873_v49 }
 0x60f   :  { %v872_v53 = vpop.xlane.xlu2 %871 }
 0x610   :  { %v876_v51 = vmul.f32 %v872_v53, %v1335_v10 }
 0x612   :  { %v878_v54 = vadd.f32 1e-05, %v876_v51 }
 0x614   :  { %1146 = vrsqrt.f32 %v878_v54  ;;  %vm886_vm10 = vweird.f32 %v878_v54 }
 0x61a   :  { %v1147_v56 = vpop.eup %1146 }
 0x61b   :  { %v881_v62 = vmul.f32 %v1147_v56, %v878_v54  ;;  %vm887_vm9 = vweird.f32 %v1147_v56 }
 0x61c   :  { %vm888_vm11 = vmor %vm886_vm10, %vm887_vm9 }
 0x61d   :  { %v882_v3 = vmul.f32 %v1147_v56, %v881_v62 }
 0x61f   :  { %v883_v4 = vmul.f32 0.5, %v882_v3  ;;  %v1107_v3 = vld [vmem:[%s1630_s13] ss:$0 sm:$0xff] }
 0x621   :  { %v884_v6 = vsub.f32 1.5, %v883_v4 }
 0x623   :  { %v885_v7 = vmul.f32 %v1147_v56, %v884_v6 }
 0x625   :  { %v889_v9 = vsel %vm888_vm11, %v1147_v56, %v885_v7 }
 0x626   :  { %v900_v11 = vmul.f32 %v889_v9, %v866_v43 }
 0x628   :  { %v905_v13 = vmul.f32 %v1104_v8, %v900_v11 }
 0x62a   :  { %v910_v16 = vadd.f32 %v1105_v12, %v905_v13 }
 0x62b   :  { %v875_v59 = vpop.xlane.xlu2 %874 }
 0x62c   :  { %v877_v1 = vmul.f32 %v875_v59, %v1335_v10  ;;  %1068 = vmatmul.msk.f32.vlgmr.msrb.gmra.mxu3 %vm82_vm0, %v910_v16 }
 0x62e   :  { %v879_v63 = vadd.f32 1e-05, %v877_v1 }
 0x630   :  { %1148 = vrsqrt.f32 %v879_v63  ;;  %vm896_vm13 = vweird.f32 %v879_v63 }
 0x636   :  { %v1149_v17 = vpop.eup %1148 }
 0x637   :  { %v891_v18 = vmul.f32 %v1149_v17, %v879_v63  ;;  %vm897_vm12 = vweird.f32 %v1149_v17 }
 0x638   :  { %vm898_vm14 = vmor %vm896_vm13, %vm897_vm12 }
 0x639   :  { %v892_v19 = vmul.f32 %v1149_v17, %v891_v18 }
 0x63b   :  { %v893_v20 = vmul.f32 0.5, %v892_v19 }
 0x63d   :  { %v894_v21 = vsub.f32 1.5, %v893_v20 }
 0x63f   :  { %v895_v22 = vmul.f32 %v1149_v17, %v894_v21 }
 0x641   :  { %v899_v10 = vsel %vm898_vm14, %v1149_v17, %v895_v22 }
 0x642   :  { %v901_v23 = vmul.f32 %v899_v10, %v867_v2 }
 0x644   :  { %v906_v24 = vmul.f32 %v1104_v8, %v901_v23 }
 0x646   :  { %v911_v55 = vadd.f32 %v1105_v12, %v906_v24 }
 0x648   :  { %1069 = vmatmul.msk.f32.gmra.mxu3 %vm82_vm0, %v911_v55 }
 0x6af   :  { %v943_v38 = vpop.f32.mrf.mxu3 }
 0x6b0   :  { %v944_v39 = vadd.f32 %v1106_v37, %v943_v38 }
 0x6b2   :  { %v951_v0 = vmul.f32 %v944_v39, %v944_v39  ;;  %v949_v46 = vmul.f32 0.5, %v944_v39 }
 0x6b4   :  { %v953_v41 = vmul.f32 %v951_v0, %v944_v39 }
 0x6b6   :  { %v955_v42 = vmul.f32 0.044715, %v953_v41 }
 0x6b8   :  { %v957_v43 = vadd.f32 %v955_v42, %v944_v39 }
 0x6ba   :  { %v959_v44 = vmul.f32 0.7978846, %v957_v43 }
 0x6bc   :  { %1150 = vtanh.f32 %v959_v44 }
 0x6c2   :  { %v1151_v45 = vpop.eup %1150 }
 0x6c3   :  { %v963_v47 = vadd.f32 1.0, %v1151_v45 }
 0x6c5   :  { %v965_v2 = vmul.f32 %v963_v47, %v949_v46 }
 0x6c7   :  { %1003 = vmatmul.f32.vlgmr.msrb.gmra.mxu0 %v965_v2 }
 0x6cb   :  { %v946_v48 = vpop.f32.mrf.mxu3 }
 0x6cc   :  { %v947_v49 = vadd.f32 %v1106_v37, %v946_v48 }
 0x6ce   :  { %v952_v57 = vmul.f32 %v947_v49, %v947_v49  ;;  %v950_v54 = vmul.f32 0.5, %v947_v49 }
 0x6d0   :  { %v954_v61 = vmul.f32 %v952_v57, %v947_v49 }
 0x6d2   :  { %v956_v50 = vmul.f32 0.044715, %v954_v61 }
 0x6d4   :  { %v958_v52 = vadd.f32 %v956_v50, %v947_v49 }
 0x6d6   :  { %v960_v53 = vmul.f32 0.7978846, %v958_v52 }
 0x6d8   :  { %1152 = vtanh.f32 %v960_v53 }
 0x6de   :  { %v1153_v51 = vpop.eup %1152 }
 0x6df   :  { %v964_v56 = vadd.f32 1.0, %v1153_v51 }
 0x6e1   :  { %v966_v62 = vmul.f32 %v964_v56, %v950_v54 }
 0x6e3   :  { %1006 = vmatmul.f32.gmra.mxu0 %v966_v62 }
 0x744   :  { %v1004_v4 = vpop.f32.mrf.mxu0 }
 0x745   :  { %v1005_v6 = vadd.f32 %v1107_v3, %v1004_v4 }
 0x747   :  { %v1010_v7 = vadd.f32 %v1005_v6, %v1516_v30 }
 0x749   :  { %1012 = vst.msk [vmem:[#allocation7] sm:$0xff] %vm82_vm0, %v1010_v7 }
 0x760   :  { %v1007_v8 = vpop.f32.mrf.mxu0 }
 0x761   :  { %v1008_v9 = vadd.f32 %v1107_v3, %v1007_v8 }
 0x763   :  { %v1011_v11 = vadd.f32 %v1008_v9, %v1521_v40 }
 0x765   :  { %1013 = vst.msk [vmem:[#allocation7 + $0x8] sm:$0xff] %vm82_vm0, %v1011_v11 }
 0x766   :  { %1026 = dma.vmem_to_hbm [thread:$0]  %s1019_s3, 256, %s1021_s7, [#allocation4], %s1233_s21, %s1233_s21, %s1234_s22  }
 0x767   :  { %1230 = dma.done.wait [#allocation4], 256  }
 0x768   :  { %1231 = vsyncadd [#allocation4], 4294967040 }
 0x769   :  { %1031 = vsyncpa [#allocation3], 1 }
 0x76a   :  { %1032 = vsyncpa [#allocation6], 1 }
 0x76b   :  { %1033 = vsyncpa [#allocation4], 1 }

</bundles_post_ra>
